<compile_context>
chip_gen: v6e
topology: v6e:2x2x1
jax: 0.10.0
libtpu: 0.0.40
codegen_flags: <defaults>
</compile_context>

<pallas_src>
import math
import functools

import jax
import jax.numpy as jnp
from jax.experimental import pallas as pl
from jax.experimental.pallas import tpu as pltpu


_NEG_LARGE = -1e30          # finite "-inf": NaN-safe under online softmax
_LANES = 128                # lane width for lane-dense m/l scratch


def _vmem_capacity_bytes():
    try:
        return int(pltpu.get_tpu_info().vmem_capacity_bytes)
    except Exception:
        return 64 * 1024 * 1024      # conservative (v7x-sized) fallback


def _vmem_limit_bytes(cap):
    # ~96 MiB on v5e/v6e (128 MiB physical), ~48 MiB on v7x (64 MiB physical).
    return min((cap * 3) // 4, 100 * 1024 * 1024)


def _default_block(t, cap):
    if t <= 128 or t % 128 != 0:
        return t
    if cap >= 96 * 1024 * 1024 and t % 256 == 0:
        return 256        # v5e/v6e: larger tiles amortize ~0.35us/step overhead, fill wide MXU
    return 128            # v7x: modest tiles to stay inside 64 MiB VMEM


def _qkv_proj_kernel(x_ref, w_ref, b_ref, q_ref, k_ref, v_ref):
    """Per-(batch, T-tile, head) fused QKV projection: one bf16 MXU matmul."""
    hd = q_ref.shape[-1]
    y = jnp.dot(x_ref[...], w_ref[...], preferred_element_type=jnp.float32) + b_ref[...]
    q_ref[...] = y[:, :hd].astype(jnp.bfloat16)          # scale already folded into W/b
    k_ref[...] = y[:, hd:2 * hd].astype(jnp.bfloat16)
    v_ref[...] = y[:, 2 * hd:].astype(jnp.bfloat16)


def _flash_window_kernel(x_ref, q_ref, k_ref, v_ref, wo_ref, bo_ref, o_ref,
                         acc_ref, m_ref, l_ref, *, window, causal, nk):
    n_head, block_q, hd = q_ref.shape
    block_k = k_ref.shape[1]

    qi = pl.program_id(1)
    j = pl.program_id(2)
    n_band = pl.num_programs(2)

    q0 = qi * block_q
    # Banded kv walk: same formula as the k/v index_maps (un-clamped here for the validity test).
    first = jnp.maximum(q0 - window, 0) // block_k
    kt = first + j
    k0 = kt * block_k
    last_key = q0 + block_q - 1 + (0 if causal else window)
    last_tile = jnp.minimum(last_key // block_k, nk - 1)

    @pl.when(j == 0)
    def _init():
        acc_ref[...] = jnp.zeros_like(acc_ref)
        m_ref[...] = jnp.full_like(m_ref, _NEG_LARGE)
        l_ref[...] = jnp.zeros_like(l_ref)

    @pl.when(kt <= last_tile)          # skip clamped-duplicate edge tiles
    def _compute():
        # In-kernel window mask for this (q-tile, kv-tile): cheap VPU iota/compare.
        row = q0 + jax.lax.broadcasted_iota(jnp.int32, (block_q, block_k), 0)
        col = k0 + jax.lax.broadcasted_iota(jnp.int32, (block_q, block_k), 1)
        diff = row - col
        if causal:
            allowed = (diff >= 0) & (diff <= window)
        else:
            allowed = jnp.abs(diff) <= window

        def head_body(h, carry):
            q_h = q_ref[h]                                   # (bq, hd) bf16, head-major slice
            k_h = k_ref[h]
            v_h = v_ref[h]
            s = jax.lax.dot_general(q_h, k_h, (((1,), (1,)), ((), ())),
                                    preferred_element_type=jnp.float32)   # (bq, bk) f32
            s = jnp.where(allowed, s, _NEG_LARGE)

            m_prev = m_ref[h][:, :1]                         # lanes are replicated
            l_prev = l_ref[h][:, :1]
            m_next = jnp.maximum(m_prev, jnp.max(s, axis=-1, keepdims=True))
            alpha = jnp.exp(m_prev - m_next)
            p = jnp.exp(s - m_next)
            l_next = alpha * l_prev + jnp.sum(p, axis=-1, keepdims=True)
            acc_ref[h] = alpha * acc_ref[h] + jax.lax.dot_general(
                p.astype(jnp.bfloat16), v_h, (((1,), (0,)), ((), ())),
                preferred_element_type=jnp.float32)          # (bq, hd) f32
            # Lane-dense stores of the online-softmax state.
            m_ref[h] = jnp.broadcast_to(m_next, (block_q, _LANES))
            l_ref[h] = jnp.broadcast_to(l_next, (block_q, _LANES))
            return carry

        jax.lax.fori_loop(0, n_head, head_body, 0)

    @pl.when(j == n_band - 1)
    def _finalize():
        out0 = x_ref[...] + bo_ref[...]                      # residual + out-proj bias (f32)

        def out_body(h, out):
            inv_l = pl.reciprocal(l_ref[h][:, :1], approx=False)
            ctx = (acc_ref[h] * inv_l).astype(jnp.bfloat16)  # (bq, hd)
            return out + jnp.dot(ctx, wo_ref[h], preferred_element_type=jnp.float32)

        out = jax.lax.fori_loop(0, n_head, out_body, out0)   # per-head out-proj accumulation
        o_ref[...] = out.astype(o_ref.dtype)                 # single lane-dense (bq, D) store


def window_attention(x, params, window_size, n_head, causal=False,
                     block_q=None, block_k=None):
    """x: (B, T, D) float32. params follow nn.MultiheadAttention's in/out projection split."""
    B, T, D = x.shape
    assert D % n_head == 0
    hd = D // n_head
    scale = 1.0 / math.sqrt(hd)

    cap = _vmem_capacity_bytes()
    vmem_limit = _vmem_limit_bytes(cap)
    block_q = _default_block(T, cap) if block_q is None else block_q
    block_k = _default_block(T, cap) if block_k is None else block_k
    assert T % block_q == 0 and T % block_k == 0
    nq = T // block_q
    nk = T // block_k

    # Banded kv axis: number of kv tiles that can intersect one q-tile's window span.
    span = (window_size + block_q) if causal else (2 * window_size + block_q)
    n_band = min(nk, pl.cdiv(span, block_k) + 1)

    # --- Head-major, pre-transposed weights (host-side, one-time) --------------------------
    wq_s = params["wq"] * scale                                     # fold softmax scale (exact)
    w_stack = jnp.stack([wq_s, params["wk"], params["wv"]], axis=0)  # (3, D_out, D_in)
    w_hm = (w_stack.reshape(3, n_head, hd, D)
                   .transpose(1, 3, 0, 2)                            # (H, D_in, 3, hd)
                   .reshape(n_head, D, 3 * hd)
                   .astype(jnp.bfloat16))                            # (H, D, 3*hd)
    b_stack = jnp.stack([params["bq"][0] * scale, params["bk"][0], params["bv"][0]], axis=0)
    b_hm = (b_stack.reshape(3, n_head, hd)
                   .transpose(1, 0, 2)
                   .reshape(n_head, 1, 3 * hd)
                   .astype(jnp.float32))                             # (H, 1, 3*hd)
    wo_hm = params["wo"].T.reshape(n_head, hd, D).astype(jnp.bfloat16)   # (H, hd, D)
    bo = params["bo"].astype(jnp.float32)                                # (1, D)

    x_bf16 = x.astype(jnp.bfloat16)        # kernel-1 input in bf16; f32 x kept for the residual

    # --- Kernel 1: fused QKV projection -> head-major bf16 q/k/v ---------------------------
    q, k, v = pl.pallas_call(
        _qkv_proj_kernel,
        out_shape=tuple(jax.ShapeDtypeStruct((B, n_head, T, hd), jnp.bfloat16)
                        for _ in range(3)),
        grid_spec=pltpu.PrefetchScalarGridSpec(
            num_scalar_prefetch=0,
            grid=(B, nq, n_head),
            in_specs=[
                pl.BlockSpec((None, block_q, D), lambda b, t, h: (b, t, 0)),    # x (bf16)
                pl.BlockSpec((None, D, 3 * hd), lambda b, t, h: (h, 0, 0)),     # W head tile
                pl.BlockSpec((None, 1, 3 * hd), lambda b, t, h: (h, 0, 0)),     # b head tile
            ],
            out_specs=[
                pl.BlockSpec((None, None, block_q, hd), lambda b, t, h: (b, h, t, 0)),
                pl.BlockSpec((None, None, block_q, hd), lambda b, t, h: (b, h, t, 0)),
                pl.BlockSpec((None, None, block_q, hd), lambda b, t, h: (b, h, t, 0)),
            ],
        ),
        compiler_params=pltpu.CompilerParams(
            dimension_semantics=("parallel", "parallel", "arbitrary"),
            vmem_limit_bytes=vmem_limit),
    )(x_bf16, w_hm, b_hm)

    # --- Kernel 2: banded flash window attention + out-proj + residual ---------------------
    def kv_map(b, qi, j):
        first = jnp.maximum(qi * block_q - window_size, 0) // block_k
        return (b, 0, jnp.minimum(first + j, nk - 1), 0)    # clamp: never OOB, dupes skipped

    attn_kernel = functools.partial(_flash_window_kernel, window=window_size,
                                    causal=causal, nk=nk)
    return pl.pallas_call(
        attn_kernel,
        out_shape=jax.ShapeDtypeStruct((B, T, D), x.dtype),
        grid_spec=pltpu.PrefetchScalarGridSpec(
            num_scalar_prefetch=0,
            grid=(B, nq, n_band),
            in_specs=[
                pl.BlockSpec((None, block_q, D), lambda b, qi, j: (b, qi, 0)),      # x residual
                pl.BlockSpec((None, n_head, block_q, hd),
                             lambda b, qi, j: (b, 0, qi, 0)),                        # q (bf16)
                pl.BlockSpec((None, n_head, block_k, hd), kv_map),                   # k (bf16)
                pl.BlockSpec((None, n_head, block_k, hd), kv_map),                   # v (bf16)
                pl.BlockSpec((n_head, hd, D), lambda b, qi, j: (0, 0, 0)),           # Wo^T hm
                pl.BlockSpec((1, D), lambda b, qi, j: (0, 0)),                       # bo (f32)
            ],
            out_specs=pl.BlockSpec((None, block_q, D), lambda b, qi, j: (b, qi, 0)),
            scratch_shapes=[
                pltpu.VMEM((n_head, block_q, hd), jnp.float32),       # per-head acc
                pltpu.VMEM((n_head, block_q, _LANES), jnp.float32),   # running max m (lane-dense)
                pltpu.VMEM((n_head, block_q, _LANES), jnp.float32),   # running sum l (lane-dense)
            ],
        ),
        compiler_params=pltpu.CompilerParams(
            # B*nq should be >= 2 for v7x megacore balance; q-tile axis is the lever if B small.
            dimension_semantics=("parallel", "parallel", "arbitrary"),
            vmem_limit_bytes=vmem_limit),
    )(x, q, k, v, wo_hm, bo)


def _reference(x, params, window_size, n_head, causal=False):
    """Pure-JAX f32 reference mirroring nn.MultiheadAttention forward + residual."""
    B, T, D = x.shape
    hd = D // n_head
    idx = jnp.arange(T)
    diff = idx[:, None] - idx[None, :]
    allowed = ((diff >= 0) & (diff <= window_size)) if causal else (jnp.abs(diff) <= window_size)
    bias = jnp.where(allowed, 0.0, -jnp.inf)

    q = x @ params["wq"].T + params["bq"][0]
    k = x @ params["wk"].T + params["bk"][0]
    v = x @ params["wv"].T + params["bv"][0]
    q = q.reshape(B, T, n_head, hd).transpose(0, 2, 1, 3) / math.sqrt(hd)
    k = k.reshape(B, T, n_head, hd).transpose(0, 2, 1, 3)
    v = v.reshape(B, T, n_head, hd).transpose(0, 2, 1, 3)
    s = jnp.einsum('bhtd,bhsd->bhts', q, k) + bias[None, None]
    p = jax.nn.softmax(s, axis=-1)
    ctx = jnp.einsum('bhts,bhsd->bhtd', p, v).transpose(0, 2, 1, 3).reshape(B, T, D)
    out = ctx @ params["wo"].T + params["bo"][0]
    return x + out


if __name__ == "__main__":
    key = jax.random.PRNGKey(0)

    def make_params(k, D):
        k1, k2 = jax.random.split(k)
        in_w = 0.05 * jax.random.normal(k1, (3 * D, D), dtype=jnp.float32)
        out_w = 0.05 * jax.random.normal(k2, (D, D), dtype=jnp.float32)
        return {
            "wq": in_w[:D], "wk": in_w[D:2 * D], "wv": in_w[2 * D:],
            "bq": jnp.full((1, D), 0.01, jnp.float32),
            "bk": jnp.full((1, D), -0.02, jnp.float32),
            "bv": jnp.full((1, D), 0.03, jnp.float32),
            "wo": out_w,
            "bo": jnp.full((1, D), 0.005, jnp.float32),
        }

    tests = [
        # (B,  T,  D, n_head, window, causal, blk_q, blk_k)
        (2, 16, 32, 4, 3, False, None, None),   # single-tile, non-causal
        (2, 32, 32, 4, 3, True, 16, 16),        # multi-tile banded grid + edge skip, causal
    ]

    for ti, (B, T, D, H, W, causal, blk_q, blk_k) in enumerate(tests):
        kx, kp, key = jax.random.split(key, 3)
        x = jax.random.normal(kx, (B, T, D), dtype=jnp.float32)
        params = make_params(kp, D)

        out = window_attention(x, params, W, H, causal=causal,
                               block_q=blk_q, block_k=blk_k)
        out = jax.block_until_ready(out)
        ref = _reference(x, params, W, H, causal=causal)

        assert out.shape == (B, T, D)
        assert bool(jnp.all(jnp.isfinite(out))), f"non-finite output in test {ti}"
        max_err = float(jnp.max(jnp.abs(out - ref)))
        assert jnp.allclose(out, ref, atol=2e-2, rtol=2e-2), \
            f"mismatch vs reference in test {ti}: max abs err {max_err}"

    print("KERNEL_OK")
</pallas_src>

<mosaic_0001>
module attributes {stable_mosaic.version = 11 : i64} {
  func.func @_qkv_proj_kernel(%arg0: i32, %arg1: i32, %arg2: i32, %arg3: memref<1x16x32xbf16, #tpu.memory_space<vmem>>, %arg4: memref<1x32x24xbf16, #tpu.memory_space<vmem>>, %arg5: memref<1x1x24xf32, #tpu.memory_space<vmem>>, %arg6: memref<1x1x16x8xbf16, #tpu.memory_space<vmem>>, %arg7: memref<1x1x16x8xbf16, #tpu.memory_space<vmem>>, %arg8: memref<1x1x16x8xbf16, #tpu.memory_space<vmem>>) attributes {dimension_semantics = [#tpu.dimension_semantics<parallel>, #tpu.dimension_semantics<parallel>, #tpu.dimension_semantics<arbitrary>], iteration_bounds = array<i64: 2, 1, 4>, scalar_prefetch = 0 : i64, scratch_operands = 0 : i64, tpu.core_type = #tpu.core_type<tc>, window_params = [{transform_indices = @transform_0, window_bounds = array<i64: 1, 16, 32>}, {transform_indices = @transform_1, window_bounds = array<i64: 1, 32, 24>}, {transform_indices = @transform_2, window_bounds = array<i64: 1, 1, 24>}, {transform_indices = @transform_3, window_bounds = array<i64: 1, 1, 16, 8>}, {transform_indices = @transform_4, window_bounds = array<i64: 1, 1, 16, 8>}, {transform_indices = @transform_5, window_bounds = array<i64: 1, 1, 16, 8>}]} {
    %c0 = arith.constant 0 : index
    %c0_0 = arith.constant 0 : index
    %c0_1 = arith.constant 0 : index
    %0 = vector.load %arg3[%c0, %c0_0, %c0_1] : memref<1x16x32xbf16, #tpu.memory_space<vmem>>, vector<1x16x32xbf16>
    %1 = vector.shape_cast %0 : vector<1x16x32xbf16> to vector<16x32xbf16>
    %c0_2 = arith.constant 0 : index
    %c0_3 = arith.constant 0 : index
    %c0_4 = arith.constant 0 : index
    %2 = vector.load %arg4[%c0_2, %c0_3, %c0_4] : memref<1x32x24xbf16, #tpu.memory_space<vmem>>, vector<1x32x24xbf16>
    %3 = vector.shape_cast %2 : vector<1x32x24xbf16> to vector<32x24xbf16>
    %cst = arith.constant dense<0.000000e+00> : vector<16x24xf32>
    %4 = tpu.matmul %1, %3, %cst {dimension_numbers = #tpu.dot_dimension_numbers<[1], [0], [0], [1], [0, 0, 1, 1], [], []>} : vector<16x32xbf16>, vector<32x24xbf16>, vector<16x24xf32> -> vector<16x24xf32>
    %c0_5 = arith.constant 0 : index
    %c0_6 = arith.constant 0 : index
    %c0_7 = arith.constant 0 : index
    %5 = vector.load %arg5[%c0_5, %c0_6, %c0_7] : memref<1x1x24xf32, #tpu.memory_space<vmem>>, vector<1x1x24xf32>
    %6 = vector.shape_cast %5 : vector<1x1x24xf32> to vector<1x24xf32>
    %7 = vector.broadcast %6 : vector<1x24xf32> to vector<16x24xf32>
    %8 = arith.addf %4, %7 : vector<16x24xf32>
    %9 = vector.extract_strided_slice %8 {offsets = [0, 0], sizes = [16, 8], strides = [1, 1]} : vector<16x24xf32> to vector<16x8xf32>
    %10 = arith.truncf %9 : vector<16x8xf32> to vector<16x8xbf16>
    %c0_8 = arith.constant 0 : index
    %c0_9 = arith.constant 0 : index
    %c0_10 = arith.constant 0 : index
    %c0_11 = arith.constant 0 : index
    %11 = vector.load %arg6[%c0_8, %c0_9, %c0_10, %c0_11] : memref<1x1x16x8xbf16, #tpu.memory_space<vmem>>, vector<1x1x16x8xbf16>
    %12 = vector.shape_cast %11 : vector<1x1x16x8xbf16> to vector<16x8xbf16>
    %13 = vector.shape_cast %10 : vector<16x8xbf16> to vector<1x1x16x8xbf16>
    tpu.vector_store %arg6[%c0_8, %c0_9, %c0_10, %c0_11], %13 {strides = array<i32>} : memref<1x1x16x8xbf16, #tpu.memory_space<vmem>>, vector<1x1x16x8xbf16>,
    %14 = vector.extract_strided_slice %8 {offsets = [0, 8], sizes = [16, 8], strides = [1, 1]} : vector<16x24xf32> to vector<16x8xf32>
    %15 = arith.truncf %14 : vector<16x8xf32> to vector<16x8xbf16>
    %c0_12 = arith.constant 0 : index
    %c0_13 = arith.constant 0 : index
    %c0_14 = arith.constant 0 : index
    %c0_15 = arith.constant 0 : index
    %16 = vector.load %arg7[%c0_12, %c0_13, %c0_14, %c0_15] : memref<1x1x16x8xbf16, #tpu.memory_space<vmem>>, vector<1x1x16x8xbf16>
    %17 = vector.shape_cast %16 : vector<1x1x16x8xbf16> to vector<16x8xbf16>
    %18 = vector.shape_cast %15 : vector<16x8xbf16> to vector<1x1x16x8xbf16>
    tpu.vector_store %arg7[%c0_12, %c0_13, %c0_14, %c0_15], %18 {strides = array<i32>} : memref<1x1x16x8xbf16, #tpu.memory_space<vmem>>, vector<1x1x16x8xbf16>,
    %19 = vector.extract_strided_slice %8 {offsets = [0, 16], sizes = [16, 8], strides = [1, 1]} : vector<16x24xf32> to vector<16x8xf32>
    %20 = arith.truncf %19 : vector<16x8xf32> to vector<16x8xbf16>
    %c0_16 = arith.constant 0 : index
    %c0_17 = arith.constant 0 : index
    %c0_18 = arith.constant 0 : index
    %c0_19 = arith.constant 0 : index
    %21 = vector.load %arg8[%c0_16, %c0_17, %c0_18, %c0_19] : memref<1x1x16x8xbf16, #tpu.memory_space<vmem>>, vector<1x1x16x8xbf16>
    %22 = vector.shape_cast %21 : vector<1x1x16x8xbf16> to vector<16x8xbf16>
    %23 = vector.shape_cast %20 : vector<16x8xbf16> to vector<1x1x16x8xbf16>
    tpu.vector_store %arg8[%c0_16, %c0_17, %c0_18, %c0_19], %23 {strides = array<i32>} : memref<1x1x16x8xbf16, #tpu.memory_space<vmem>>, vector<1x1x16x8xbf16>,
    return
  }
  func.func @transform_0(%arg0: i32, %arg1: i32, %arg2: i32) -> (i32, i32, i32) {
    %c0_i32 = arith.constant 0 : i32
    %c0_i32_0 = arith.constant 0 : i32
    return %arg0, %arg1, %c0_i32 : i32, i32, i32
  }
  func.func @transform_1(%arg0: i32, %arg1: i32, %arg2: i32) -> (i32, i32, i32) {
    %c0_i32 = arith.constant 0 : i32
    %c0_i32_0 = arith.constant 0 : i32
    %c0_i32_1 = arith.constant 0 : i32
    return %arg2, %c0_i32, %c0_i32_0 : i32, i32, i32
  }
  func.func @transform_2(%arg0: i32, %arg1: i32, %arg2: i32) -> (i32, i32, i32) {
    %c0_i32 = arith.constant 0 : i32
    %c0_i32_0 = arith.constant 0 : i32
    %c0_i32_1 = arith.constant 0 : i32
    return %arg2, %c0_i32, %c0_i32_0 : i32, i32, i32
  }
  func.func @transform_3(%arg0: i32, %arg1: i32, %arg2: i32) -> (i32, i32, i32, i32) {
    %c0_i32 = arith.constant 0 : i32
    %c0_i32_0 = arith.constant 0 : i32
    return %arg0, %arg2, %arg1, %c0_i32 : i32, i32, i32, i32
  }
  func.func @transform_4(%arg0: i32, %arg1: i32, %arg2: i32) -> (i32, i32, i32, i32) {
    %c0_i32 = arith.constant 0 : i32
    %c0_i32_0 = arith.constant 0 : i32
    return %arg0, %arg2, %arg1, %c0_i32 : i32, i32, i32, i32
  }
  func.func @transform_5(%arg0: i32, %arg1: i32, %arg2: i32) -> (i32, i32, i32, i32) {
    %c0_i32 = arith.constant 0 : i32
    %c0_i32_0 = arith.constant 0 : i32
    return %arg0, %arg2, %arg1, %c0_i32 : i32, i32, i32, i32
  }
}

</mosaic_0001>

<bundles_post_ra>
// kernel: tpu_custom_call.1
= control target key start
LH: loop header
LB: loop body
LE: loop exit
PB: predicated region body
PF: predicated region fallthrough
CT: control target
= control target key end

     0   :  { %s910_s18 = smov 0   ;;  %s912_s19 = smov 0   ;;  %s979_s0 = inlined_call_operand.vmem [shape: bf16[2,16,32], index: 0, kind: input, shape index: {}]   ;;  %s980_s1 = inlined_call_operand.vmem [shape: bf16[4,32,24], index: 1, kind: input, shape index: {}]   ;;  %s981_s2 = inlined_call_operand.vmem [shape: f32[4,1,24], index: 2, kind: input, shape index: {}]   ;;  %s982_s3 = inlined_call_operand.vmem [shape: bf16[2,4,16,8], index: 3, kind: output, shape index: {0}]   ;;  %s983_s4 = inlined_call_operand.vmem [shape: bf16[2,4,16,8], index: 4, kind: output, shape index: {1}]   ;;  %s984_s5 = inlined_call_operand.vmem [shape: bf16[2,4,16,8], index: 5, kind: output, shape index: {2}]  }
   0x1   :  { %s914_s20 = smov 0   ;;  %s916_s21 = smov 0  }
   0x2   :  { %s918_s22 = smov 0  }
   0x3 LB: > { %s28_s23 = sadd.s32 1, %s866_s20  ;;  %s35_s24 = sadd.s32 1, %s870_s21  ;;  %s874_s22 = sphi %s918_s22, %s16_s22   ;;  %s870_s21 = sphi %s916_s21, %s988_s21   ;;  %s866_s20 = sphi %s914_s20, %s987_s20   ;;  %s862_s19 = sphi %s912_s19, %s986_s19   ;;  %s858_s18 = sphi %s910_s18, %s985_s18  }
   0x4   : > { %p29_p0 = scmp.ge.s32.totalorder %s28_s23, 4  ;;  %p751_p1 = scmp.ge.s32.totalorder %s874_s22, 1 }
   0x5   : > { %p248_p2 = scmp.lt.s32.totalorder %s874_s22, 9 }
   0x6   : > { %s990_s23 = smov (%p29_p0, %s28_s23), 0  ;;  %s992_s24 = smov (!%p29_p0, %s35_s24), %s870_s21 }
   0x7   : > { %p249_p3 = pnand %p751_p1, %p248_p2  ;;  %p37_p4 = scmp.ge.s32.totalorder %s992_s24, 2 }
   0x8   : > { %p332_p5 = scmp.lt.s32.totalorder (!%p249_p3), %s858_s18, 3  ;;  %p323_p6 = scmp.lt.s32.totalorder (!%p249_p3), %s862_s19, 1 }
   0x9   : > { %s994_s24 = smov (%p37_p4, %s992_s24), 0  ;;  %252 = sbr.rel (%p249_p3) target bundleno = 342 (0x156), region = 32 }
   0xa   : > { %s878_s17 = smov (!%p249_p3), 112  }
   0xe   : > { %v876_v0 = vmov 0.0   ;;  %vm877_vm0 = vmmov 0   ;;  %s996_s18 = smov (!%p332_p5, %s858_s18), 3  ;;  %s998_s19 = smov (!%p323_p6, %s862_s19), 1  ;;  %vm413_vm1 = vcmask 261120   ;;  %vm466_vm2 = vcmask 60416  }
   0xf   : > { %781 = vmatprep.subr.bf16.mxu0 %v876_v0  ;;  %785 = vmatprep.mubr.msk.bf16.mxu0 %vm877_vm0, %v876_v0  ;;  %s775_s25 = sshll.u32 %s996_s18, 4  ;;  %s774_s29 = sshll.u32 %s998_s19, 3 }
  0x10   : > { %s336_s28 = scalar_lea.vmem %s980_s1, %s775_s25  ;;  %s756_s30 = sshll.u32 %s996_s18, 1 }
  0x11   : > { %v833_v1 = vld [vmem:[%s336_s28 + $0x8] sm:$0xff]   ;;  %s330_s8 = scalar_lea.vmem %s979_s0, %s774_s29  ;;  %s350_s9 = sadd.s32 %s774_s29, %s756_s30  ;;  %v834_v2 = vld [vmem:[%s336_s28] sm:$0xff]  }
  0x12   : > { %782 = vmatpush3.bf16.msra.mxu0 %v833_v1  ;;  %v835_v3 = vld [vmem:[%s330_s8] sm:$0xff]   ;;  %s339_s12 = scalar_lea.vmem %s981_s2, %s996_s18  ;;  %s758_s13 = sshll.u32 %s350_s9, 2 }
  0x13   : > { %783 = vmatprep.subr.bf16.mxu0 %v876_v0  ;;  %v765_v4 = vld [vmem:[%s339_s12] ss:$0 sm:$0xff]  ;;  %s352_s16 = scalar_lea.vmem %s982_s3, %s758_s13  ;;  %s879_s19 = smov 120  }
  0x14   : > { %s380_s26 = scalar_lea.vmem %s984_s5, %s758_s13  ;;  %s366_s29 = scalar_lea.vmem %s983_s4, %s758_s13 }
  0x16   : > { %784 = vmatpush3.bf16.msra.mxu0 %v834_v2 }
  0x19   : > { %786 = vmatmul.mubr.msk.bf16.vlgmr.msra.gmra.mxu0 %vm413_vm1, %v835_v3 }
  0xd9   : > { %v451_v5 = vpop.f32.mrf.mxu0 }
  0xda   : > { %v452_v6 = vadd.f32 %v765_v4, %v451_v5 }
  0xdb   : > { %v787_v7 = vpop.f32.mrf.mxu0 }
  0xdc   : > { %v776_v8 = vpack.c.bf16 %v452_v6, %v452_v6 }
  0xdd   : > { %v454_v9 = vpop.f32.mrf.mxu0 }
  0xde   : > { %467 = vst.msk [vmem:[%s352_s16] sm:$0xf] %vm466_vm2, %v776_v8  ;;  %v455_v10 = vadd.f32 %v765_v4, %v454_v9  ;;  %477 = vrot.lane.b32.xlu1 %v776_v8, %s878_s17  ;;  %469 = vrot.lane.b32.xlu0 %v776_v8, %s879_s19 }
  0xdf   : > { %v788_v11 = vpop.f32.mrf.mxu0 }
  0xe0   : > { %v777_v12 = vpack.c.bf16 %v455_v10, %v455_v10 }
  0xe2   : > { %468 = vst.msk [vmem:[%s352_s16 + $0x4] sm:$0xf] %vm466_vm2, %v777_v12  ;;  %479 = vrot.lane.b32.xlu1 %v777_v12, %s878_s17  ;;  %471 = vrot.lane.b32.xlu0 %v777_v12, %s879_s19 }
 0x150   : > { %v478_v13 = vpop.permute.xlu1 %477  ;;  %v470_v14 = vpop.permute.xlu0 %469 }
 0x151   : > { %483 = vst.msk [vmem:[%s380_s26] sm:$0xf] %vm466_vm2, %v478_v13  ;;  %475 = vst.msk [vmem:[%s366_s29] sm:$0xf] %vm466_vm2, %v470_v14 }
 0x154   : > { %v480_v15 = vpop.permute.xlu1 %479  ;;  %v472_v16 = vpop.permute.xlu0 %471 }
 0x155   : > { %484 = vst.msk [vmem:[%s380_s26 + $0x4] sm:$0xf] %vm466_vm2, %v480_v15  ;;  %476 = vst.msk [vmem:[%s366_s29 + $0x4] sm:$0xf] %vm466_vm2, %v472_v16 }
 0x156 PF: > { %s16_s22 = sadd.s32 1, %s874_s22   ;;  %s985_s18 = smov %s866_s20 }
 0x157   : > { %p13_p7 = scmp.ge.s32.totalorder %s16_s22, 10   ;;  %s986_s19 = smov %s870_s21 }
 0x158   : > { %s987_s20 = smov %s990_s23  ;;  %s988_s21 = smov %s994_s24 }
 0x159   :  { %15 = sbr.rel (!%p13_p7) target bundleno = 3 (0x3), region = 92 }

</bundles_post_ra>
